<compile_context>
chip_gen: v7x
topology: tpu7x:2x2x1
jax: 0.10.0
libtpu: 0.0.40
codegen_flags: <defaults>
</compile_context>

<pallas_src>
import functools

import jax
import jax.numpy as jnp
from jax.experimental import pallas as pl
from jax.experimental.pallas import tpu as pltpu


def _make_kernel(level_shapes, ks, pad_flags, out_dtype):
    """Build the fused pyramid kernel.

    level_shapes[i] = (Ho, Wo) of level i, ks[i] = pooling size (4 then 2),
    pad_flags[i] = whether level i's output must be zero-padded to even H/W
    before being consumed by level i+1.
    """
    num_levels = len(level_shapes)

    def kernel(x_ref, *refs):
        out_refs = refs[:num_levels]
        scratch_refs = refs[num_levels:]
        cblk = x_ref.shape[-1]

        src = x_ref
        s_idx = 0
        for i in range(num_levels):
            k = ks[i]
            ho, wo = level_shapes[i]

            # W-direction pooling: k sublane-strided loads, summed in f32.
            acc = None
            for dj in range(k):
                col = src[pl.ds(0, ho * k), pl.ds(dj, wo, stride=k), :]
                col = col.astype(jnp.float32)
                acc = col if acc is None else acc + col

            # H-direction pooling: split the leading dim and reduce (slab adds
            # only; the tiled (Wo, Cblk) minor dims are untouched).
            y = acc.reshape(ho, k, wo, cblk).sum(axis=1) * (1.0 / (k * k))
            y = y.astype(out_dtype)
            out_refs[i][...] = y

            if i + 1 < num_levels:
                if pad_flags[i]:
                    # Pad-to-even with zeros before the next 2x2 pool.
                    pad_ref = scratch_refs[s_idx]
                    s_idx += 1
                    pad_ref[...] = jnp.zeros(pad_ref.shape, out_dtype)
                    pad_ref[0:ho, 0:wo, :] = y
                    src = pad_ref
                else:
                    src = out_refs[i]

    return kernel


def _pick_cblk(nc, h, w, itemsize):
    """Channels per grid step: as large as a modest VMEM budget allows
    (double-buffered input block), preferring lane-aligned (x128) divisors."""
    budget = 8 * 1024 * 1024  # per-buffer budget; well under 32 MiB scoped VMEM
    max_c = max(1, budget // (2 * h * w * itemsize))
    if nc <= max_c:
        return nc
    for c in range(min(nc, max_c), 0, -1):
        if nc % c == 0 and c % 128 == 0:
            return c
    return nc  # fall back to a single full-channel block


@functools.partial(jax.jit, static_argnums=(1,))
def depth_pooling(d, num_layers):
    """Pallas equivalent of DepthPooling.forward for NCHW input.

    Returns a list of pooled maps: level 0 is 4x4/stride-4 average pooling,
    later levels are 2x2/stride-2, each preceded by pad-to-even with zeros."""
    n, c, h, w = d.shape
    nc = n * c
    dtype = d.dtype

    # Level-0 pad-to-even (matches F.pad(d, (0, W%2, 0, H%2))).
    h0, w0 = h + h % 2, w + w % 2
    if (h0, w0) != (h, w):
        d = jnp.pad(d, ((0, 0), (0, 0), (0, h0 - h), (0, w0 - w)))

    # NCHW -> (H, W, N*C): channels on the lane axis.
    xk = jnp.transpose(d.reshape(nc, h0, w0), (1, 2, 0))

    # Static per-level shape chain (floor sizes; pad-to-even between levels).
    level_shapes, ks, pad_flags = [], [], []
    cur_h, cur_w = h0, w0
    for i in range(num_layers):
        k = 4 if i == 0 else 2
        ho = (cur_h - k) // k + 1
        wo = (cur_w - k) // k + 1
        ks.append(k)
        level_shapes.append((ho, wo))
        pad_flags.append((ho % 2 != 0) or (wo % 2 != 0))
        cur_h, cur_w = ho + ho % 2, wo + wo % 2

    cblk = _pick_cblk(nc, h0, w0, jnp.dtype(dtype).itemsize)
    grid = (nc // cblk,)

    scratch_shapes = []
    for i in range(num_layers - 1):
        if pad_flags[i]:
            ho, wo = level_shapes[i]
            scratch_shapes.append(
                pltpu.VMEM((ho + ho % 2, wo + wo % 2, cblk), dtype))

    kernel = _make_kernel(tuple(level_shapes), tuple(ks), tuple(pad_flags), dtype)

    outs = pl.pallas_call(
        kernel,
        out_shape=[jax.ShapeDtypeStruct((ho, wo, nc), dtype)
                   for (ho, wo) in level_shapes],
        grid=grid,
        in_specs=[pl.BlockSpec((h0, w0, cblk), lambda i: (0, 0, i))],
        out_specs=[pl.BlockSpec((ho, wo, cblk), lambda i: (0, 0, i))
                   for (ho, wo) in level_shapes],
        scratch_shapes=scratch_shapes,
        compiler_params=pltpu.CompilerParams(
            dimension_semantics=("parallel",),
            vmem_limit_bytes=32 * 1024 * 1024,
        ),
    )(xk)

    # (Ho, Wo, N*C) -> NCHW for each level.
    results = []
    for (ho, wo), o in zip(level_shapes, outs):
        results.append(jnp.transpose(o, (2, 0, 1)).reshape(n, c, ho, wo))
    return results


# ---------------------------- pure-JAX reference ----------------------------

def _ref_avg_pool(x, k):
    n, c, h, w = x.shape
    ph, pw = h % 2, w % 2
    if ph or pw:
        x = jnp.pad(x, ((0, 0), (0, 0), (0, ph), (0, pw)))
        h, w = h + ph, w + pw
    ho, wo = (h - k) // k + 1, (w - k) // k + 1
    xc = x[:, :, : ho * k, : wo * k]
    return xc.reshape(n, c, ho, k, wo, k).mean(axis=(3, 5))


def _ref_depth_pooling(d, num_layers):
    outs = []
    for i in range(num_layers):
        d = _ref_avg_pool(d, 4 if i == 0 else 2)
        outs.append(d)
    return outs


if __name__ == "__main__":
    # Case 1: shapes consistent with the module: batch=2, channels=4, spatial=16.
    key = jax.random.PRNGKey(0)
    x = jax.random.normal(key, (2, 4, 16, 16), dtype=jnp.float32)
    num_layers = 3  # 16x16 -> 4x4 -> 2x2 -> 1x1

    outs = depth_pooling(x, num_layers)
    outs = [jax.block_until_ready(o) for o in outs]
    refs = _ref_depth_pooling(x, num_layers)
    for o, r in zip(outs, refs):
        assert o.shape == r.shape, (o.shape, r.shape)
        assert jnp.allclose(o, r, atol=1e-5, rtol=1e-5)

    # Case 2: odd sizes, exercises the in-kernel pad-to-even (scratch) path.
    x2 = jax.random.normal(jax.random.PRNGKey(0), (1, 3, 10, 14), dtype=jnp.float32)
    outs2 = depth_pooling(x2, 2)
    outs2 = [jax.block_until_ready(o) for o in outs2]
    refs2 = _ref_depth_pooling(x2, 2)
    for o, r in zip(outs2, refs2):
        assert o.shape == r.shape, (o.shape, r.shape)
        assert jnp.allclose(o, r, atol=1e-5, rtol=1e-5)

    print("KERNEL_OK")
</pallas_src>

<mosaic_0001>
module attributes {stable_mosaic.version = 11 : i64} {
  func.func @kernel(%arg0: i32, %arg1: memref<16x16x8xf32, #tpu.memory_space<vmem>>, %arg2: memref<4x4x8xf32, #tpu.memory_space<vmem>>, %arg3: memref<2x2x8xf32, #tpu.memory_space<vmem>>, %arg4: memref<1x1x8xf32, #tpu.memory_space<vmem>>) attributes {dimension_semantics = [#tpu.dimension_semantics<parallel>], iteration_bounds = array<i64: 1>, scalar_prefetch = 0 : i64, scratch_operands = 0 : i64, tpu.core_type = #tpu.core_type<tc>, window_params = [{transform_indices = @transform_0, window_bounds = array<i64: 16, 16, 8>}, {transform_indices = @transform_1, window_bounds = array<i64: 4, 4, 8>}, {transform_indices = @transform_2, window_bounds = array<i64: 2, 2, 8>}, {transform_indices = @transform_3, window_bounds = array<i64: 1, 1, 8>}]} {
    %c0 = arith.constant 0 : index
    %c0_0 = arith.constant 0 : index
    %c0_1 = arith.constant 0 : index
    %0 = tpu.strided_load %arg1[%c0, %c0_0, %c0_1] {strides = array<i32: 1, 4, 1>} : memref<16x16x8xf32, #tpu.memory_space<vmem>>, vector<16x4x8xf32>
    %c0_2 = arith.constant 0 : index
    %c1 = arith.constant 1 : index
    %c0_3 = arith.constant 0 : index
    %1 = tpu.strided_load %arg1[%c0_2, %c1, %c0_3] {strides = array<i32: 1, 4, 1>} : memref<16x16x8xf32, #tpu.memory_space<vmem>>, vector<16x4x8xf32>
    %2 = arith.addf %0, %1 : vector<16x4x8xf32>
    %c0_4 = arith.constant 0 : index
    %c2 = arith.constant 2 : index
    %c0_5 = arith.constant 0 : index
    %3 = tpu.strided_load %arg1[%c0_4, %c2, %c0_5] {strides = array<i32: 1, 4, 1>} : memref<16x16x8xf32, #tpu.memory_space<vmem>>, vector<16x4x8xf32>
    %4 = arith.addf %2, %3 : vector<16x4x8xf32>
    %c0_6 = arith.constant 0 : index
    %c3 = arith.constant 3 : index
    %c0_7 = arith.constant 0 : index
    %5 = tpu.strided_load %arg1[%c0_6, %c3, %c0_7] {strides = array<i32: 1, 4, 1>} : memref<16x16x8xf32, #tpu.memory_space<vmem>>, vector<16x4x8xf32>
    %6 = arith.addf %4, %5 : vector<16x4x8xf32>
    %7 = vector.shape_cast %6 : vector<16x4x8xf32> to vector<4x4x4x8xf32>
    %cst = arith.constant dense<0.000000e+00> : vector<4x4x8xf32>
    %8 = vector.multi_reduction <add>, %7, %cst [1] : vector<4x4x4x8xf32> to vector<4x4x8xf32>
    %cst_8 = arith.constant 6.250000e-02 : f32
    %9 = vector.broadcast %cst_8 : f32 to vector<4x4x8xf32>
    %10 = arith.mulf %8, %9 : vector<4x4x8xf32>
    %c0_9 = arith.constant 0 : index
    %c0_10 = arith.constant 0 : index
    %c0_11 = arith.constant 0 : index
    %11 = vector.load %arg2[%c0_9, %c0_10, %c0_11] : memref<4x4x8xf32, #tpu.memory_space<vmem>>, vector<4x4x8xf32>
    tpu.vector_store %arg2[%c0_9, %c0_10, %c0_11], %10 {strides = array<i32>} : memref<4x4x8xf32, #tpu.memory_space<vmem>>, vector<4x4x8xf32>,
    %c0_12 = arith.constant 0 : index
    %c0_13 = arith.constant 0 : index
    %c0_14 = arith.constant 0 : index
    %12 = tpu.strided_load %arg2[%c0_12, %c0_13, %c0_14] {strides = array<i32: 1, 2, 1>} : memref<4x4x8xf32, #tpu.memory_space<vmem>>, vector<4x2x8xf32>
    %c0_15 = arith.constant 0 : index
    %c1_16 = arith.constant 1 : index
    %c0_17 = arith.constant 0 : index
    %13 = tpu.strided_load %arg2[%c0_15, %c1_16, %c0_17] {strides = array<i32: 1, 2, 1>} : memref<4x4x8xf32, #tpu.memory_space<vmem>>, vector<4x2x8xf32>
    %14 = arith.addf %12, %13 : vector<4x2x8xf32>
    %15 = vector.shape_cast %14 : vector<4x2x8xf32> to vector<2x2x2x8xf32>
    %cst_18 = arith.constant dense<0.000000e+00> : vector<2x2x8xf32>
    %16 = vector.multi_reduction <add>, %15, %cst_18 [1] : vector<2x2x2x8xf32> to vector<2x2x8xf32>
    %cst_19 = arith.constant 2.500000e-01 : f32
    %17 = vector.broadcast %cst_19 : f32 to vector<2x2x8xf32>
    %18 = arith.mulf %16, %17 : vector<2x2x8xf32>
    %c0_20 = arith.constant 0 : index
    %c0_21 = arith.constant 0 : index
    %c0_22 = arith.constant 0 : index
    %19 = vector.load %arg3[%c0_20, %c0_21, %c0_22] : memref<2x2x8xf32, #tpu.memory_space<vmem>>, vector<2x2x8xf32>
    tpu.vector_store %arg3[%c0_20, %c0_21, %c0_22], %18 {strides = array<i32>} : memref<2x2x8xf32, #tpu.memory_space<vmem>>, vector<2x2x8xf32>,
    %c0_23 = arith.constant 0 : index
    %c0_24 = arith.constant 0 : index
    %c0_25 = arith.constant 0 : index
    %20 = tpu.strided_load %arg3[%c0_23, %c0_24, %c0_25] {strides = array<i32: 1, 2, 1>} : memref<2x2x8xf32, #tpu.memory_space<vmem>>, vector<2x1x8xf32>
    %c0_26 = arith.constant 0 : index
    %c1_27 = arith.constant 1 : index
    %c0_28 = arith.constant 0 : index
    %21 = tpu.strided_load %arg3[%c0_26, %c1_27, %c0_28] {strides = array<i32: 1, 2, 1>} : memref<2x2x8xf32, #tpu.memory_space<vmem>>, vector<2x1x8xf32>
    %22 = arith.addf %20, %21 : vector<2x1x8xf32>
    %23 = vector.shape_cast %22 : vector<2x1x8xf32> to vector<1x2x1x8xf32>
    %cst_29 = arith.constant dense<0.000000e+00> : vector<1x1x8xf32>
    %24 = vector.multi_reduction <add>, %23, %cst_29 [1] : vector<1x2x1x8xf32> to vector<1x1x8xf32>
    %cst_30 = arith.constant 2.500000e-01 : f32
    %25 = vector.broadcast %cst_30 : f32 to vector<1x1x8xf32>
    %26 = arith.mulf %24, %25 : vector<1x1x8xf32>
    %c0_31 = arith.constant 0 : index
    %c0_32 = arith.constant 0 : index
    %c0_33 = arith.constant 0 : index
    %27 = vector.load %arg4[%c0_31, %c0_32, %c0_33] : memref<1x1x8xf32, #tpu.memory_space<vmem>>, vector<1x1x8xf32>
    tpu.vector_store %arg4[%c0_31, %c0_32, %c0_33], %26 {strides = array<i32>} : memref<1x1x8xf32, #tpu.memory_space<vmem>>, vector<1x1x8xf32>,
    return
  }
  func.func @transform_0(%arg0: i32) -> (i32, i32, i32) {
    %c0_i32 = arith.constant 0 : i32
    %c0_i32_0 = arith.constant 0 : i32
    %c0_i32_1 = arith.constant 0 : i32
    return %c0_i32, %c0_i32_0, %arg0 : i32, i32, i32
  }
  func.func @transform_1(%arg0: i32) -> (i32, i32, i32) {
    %c0_i32 = arith.constant 0 : i32
    %c0_i32_0 = arith.constant 0 : i32
    %c0_i32_1 = arith.constant 0 : i32
    return %c0_i32, %c0_i32_0, %arg0 : i32, i32, i32
  }
  func.func @transform_2(%arg0: i32) -> (i32, i32, i32) {
    %c0_i32 = arith.constant 0 : i32
    %c0_i32_0 = arith.constant 0 : i32
    %c0_i32_1 = arith.constant 0 : i32
    return %c0_i32, %c0_i32_0, %arg0 : i32, i32, i32
  }
  func.func @transform_3(%arg0: i32) -> (i32, i32, i32) {
    %c0_i32 = arith.constant 0 : i32
    %c0_i32_0 = arith.constant 0 : i32
    %c0_i32_1 = arith.constant 0 : i32
    return %c0_i32, %c0_i32_0, %arg0 : i32, i32, i32
  }
}

</mosaic_0001>

<bundles_post_ra>
// kernel: depth_pooling.1
= control target key start
LH: loop header
LB: loop body
LE: loop exit
PB: predicated region body
PF: predicated region fallthrough
CT: control target
= control target key end

     0   :  { %vm186_vm0 = vcmask 60416   ;;  %vm242_vm1 = vcmask 58368   ;;  %vm262_vm2 = vcmask 57344   ;;  %s648_s0 = inlined_call_operand.vmem [shape: f32[16,16,8], index: 0, kind: input, shape index: {}]   ;;  %s649_s1 = inlined_call_operand.vmem [shape: f32[4,4,8], index: 1, kind: output, shape index: {0}]   ;;  %s650_s2 = inlined_call_operand.vmem [shape: f32[2,2,8], index: 2, kind: output, shape index: {1}]   ;;  %s651_s3 = inlined_call_operand.vmem [shape: f32[1,1,8], index: 3, kind: output, shape index: {2}]  }
   0x1   :  { %v11_v0 = vld [vmem:[%s648_s0] ss:$4 sm:$0xf]  ;;  %v280_v1 = vld [vmem:[%s648_s0 + $0x10] ss:$4 sm:$0xf] }
   0x2   :  { %v281_v2 = vld [vmem:[%s648_s0 + $0x20] ss:$4 sm:$0xf]  ;;  %v282_v3 = vld [vmem:[%s648_s0 + $0x30] ss:$4 sm:$0xf] }
   0x3   :  { %v295_v4 = vld [vmem:[%s648_s0 + $0x1] ss:$4 sm:$0xf]  ;;  %v296_v5 = vld [vmem:[%s648_s0 + $0x11] ss:$4 sm:$0xf] }
   0x4   :  { %v297_v6 = vld [vmem:[%s648_s0 + $0x21] ss:$4 sm:$0xf]  ;;  %v298_v7 = vld [vmem:[%s648_s0 + $0x31] ss:$4 sm:$0xf]  ;;  %v74_v8 = vadd.f32 %v295_v4, %v11_v0  ;;  %v75_v9 = vadd.f32 %v296_v5, %v280_v1 }
   0x5   :  { %v76_v10 = vadd.f32 %v297_v6, %v281_v2  ;;  %v77_v11 = vadd.f32 %v298_v7, %v282_v3  ;;  %v311_v12 = vld [vmem:[%s648_s0 + $0x2] ss:$4 sm:$0xf]  ;;  %v312_v13 = vld [vmem:[%s648_s0 + $0x12] ss:$4 sm:$0xf] }
   0x6   :  { %v313_v14 = vld [vmem:[%s648_s0 + $0x22] ss:$4 sm:$0xf]  ;;  %v314_v15 = vld [vmem:[%s648_s0 + $0x32] ss:$4 sm:$0xf]  ;;  %v122_v16 = vadd.f32 %v311_v12, %v74_v8  ;;  %v123_v17 = vadd.f32 %v312_v13, %v75_v9 }
   0x7   :  { %v124_v18 = vadd.f32 %v313_v14, %v76_v10  ;;  %v125_v19 = vadd.f32 %v314_v15, %v77_v11  ;;  %v327_v20 = vld [vmem:[%s648_s0 + $0x3] ss:$4 sm:$0xf]  ;;  %v328_v21 = vld [vmem:[%s648_s0 + $0x13] ss:$4 sm:$0xf] }
   0x8   :  { %v329_v22 = vld [vmem:[%s648_s0 + $0x23] ss:$4 sm:$0xf]  ;;  %v330_v23 = vld [vmem:[%s648_s0 + $0x33] ss:$4 sm:$0xf]  ;;  %v170_v24 = vadd.f32 %v327_v20, %v122_v16  ;;  %v171_v25 = vadd.f32 %v328_v21, %v123_v17 }
   0x9   :  { %v172_v26 = vadd.f32 %v329_v22, %v124_v18  ;;  %v173_v27 = vadd.f32 %v330_v23, %v125_v19  ;;  %v283_v28 = vld [vmem:[%s648_s0 + $0x40] ss:$4 sm:$0xf]  ;;  %v284_v29 = vld [vmem:[%s648_s0 + $0x50] ss:$4 sm:$0xf] }
   0xa   :  { %v187_v30 = vsel %vm186_vm0, %v170_v24, 0.0  ;;  %v188_v31 = vsel %vm186_vm0, %v171_v25, 0.0  ;;  %v285_v32 = vld [vmem:[%s648_s0 + $0x60] ss:$4 sm:$0xf] }
   0xb   :  { %v189_v33 = vadd.f32 %v188_v31, %v187_v30  ;;  %v190_v34 = vsel %vm186_vm0, %v172_v26, 0.0  ;;  %v192_v35 = vsel %vm186_vm0, %v173_v27, 0.0  ;;  %v286_v36 = vld [vmem:[%s648_s0 + $0x70] ss:$4 sm:$0xf] }
   0xc   :  { %v299_v37 = vld [vmem:[%s648_s0 + $0x41] ss:$4 sm:$0xf]  ;;  %v300_v38 = vld [vmem:[%s648_s0 + $0x51] ss:$4 sm:$0xf] }
   0xd   :  { %v191_v39 = vadd.f32 %v190_v34, %v189_v33  ;;  %v301_v40 = vld [vmem:[%s648_s0 + $0x61] ss:$4 sm:$0xf]  ;;  %v302_v41 = vld [vmem:[%s648_s0 + $0x71] ss:$4 sm:$0xf]  ;;  %v78_v42 = vadd.f32 %v299_v37, %v283_v28  ;;  %v79_v43 = vadd.f32 %v300_v38, %v284_v29 }
   0xe   :  { %v80_v44 = vadd.f32 %v301_v40, %v285_v32  ;;  %v81_v45 = vadd.f32 %v302_v41, %v286_v36  ;;  %v315_v46 = vld [vmem:[%s648_s0 + $0x42] ss:$4 sm:$0xf]  ;;  %v316_v47 = vld [vmem:[%s648_s0 + $0x52] ss:$4 sm:$0xf] }
   0xf   :  { %v193_v48 = vadd.f32 %v192_v35, %v191_v39  ;;  %v317_v49 = vld [vmem:[%s648_s0 + $0x62] ss:$4 sm:$0xf]  ;;  %v318_v50 = vld [vmem:[%s648_s0 + $0x72] ss:$4 sm:$0xf]  ;;  %v126_v51 = vadd.f32 %v315_v46, %v78_v42  ;;  %v127_v52 = vadd.f32 %v316_v47, %v79_v43 }
  0x10   :  { %v128_v53 = vadd.f32 %v317_v49, %v80_v44  ;;  %v129_v54 = vadd.f32 %v318_v50, %v81_v45  ;;  %v331_v55 = vld [vmem:[%s648_s0 + $0x43] ss:$4 sm:$0xf]  ;;  %v332_v56 = vld [vmem:[%s648_s0 + $0x53] ss:$4 sm:$0xf] }
  0x11   :  { %v215_v57 = vmul.f32 0.0625, %v193_v48  ;;  %v333_v58 = vld [vmem:[%s648_s0 + $0x63] ss:$4 sm:$0xf]  ;;  %v174_v59 = vadd.f32 %v331_v55, %v126_v51  ;;  %v175_v60 = vadd.f32 %v332_v56, %v127_v52 }
  0x12   :  { %v334_v61 = vld [vmem:[%s648_s0 + $0x73] ss:$4 sm:$0xf]  ;;  %v176_v62 = vadd.f32 %v333_v58, %v128_v53  ;;  %v287_v63 = vld [vmem:[%s648_s0 + $0x80] ss:$4 sm:$0xf] }
  0x13   :  { %219 = vst.msk [vmem:[%s649_s1] sm:$0xf] %vm186_vm0, %v215_v57  ;;  %v177_v0 = vadd.f32 %v334_v61, %v129_v54  ;;  %v194_v1 = vsel %vm186_vm0, %v174_v59, 0.0  ;;  %v195_v2 = vsel %vm186_vm0, %v175_v60, 0.0 }
  0x14   :  { %v288_v3 = vld [vmem:[%s648_s0 + $0x90] ss:$4 sm:$0xf]  ;;  %v196_v4 = vadd.f32 %v195_v2, %v194_v1  ;;  %v197_v5 = vsel %vm186_vm0, %v176_v62, 0.0 }
  0x15   :  { %v289_v6 = vld [vmem:[%s648_s0 + $0xa0] ss:$4 sm:$0xf]  ;;  %v199_v7 = vsel %vm186_vm0, %v177_v0, 0.0 }
  0x16   :  { %v290_v8 = vld [vmem:[%s648_s0 + $0xb0] ss:$4 sm:$0xf]  ;;  %v198_v9 = vadd.f32 %v197_v5, %v196_v4  ;;  %v303_v10 = vld [vmem:[%s648_s0 + $0x81] ss:$4 sm:$0xf] }
  0x17   :  { %v304_v11 = vld [vmem:[%s648_s0 + $0x91] ss:$4 sm:$0xf]  ;;  %v305_v12 = vld [vmem:[%s648_s0 + $0xa1] ss:$4 sm:$0xf]  ;;  %v82_v14 = vadd.f32 %v303_v10, %v287_v63 }
  0x18   :  { %v306_v13 = vld [vmem:[%s648_s0 + $0xb1] ss:$4 sm:$0xf]  ;;  %v83_v15 = vadd.f32 %v304_v11, %v288_v3  ;;  %v200_v16 = vadd.f32 %v199_v7, %v198_v9  ;;  %v84_v17 = vadd.f32 %v305_v12, %v289_v6  ;;  %v319_v19 = vld [vmem:[%s648_s0 + $0x82] ss:$4 sm:$0xf] }
  0x19   :  { %v85_v18 = vadd.f32 %v306_v13, %v290_v8  ;;  %v320_v20 = vld [vmem:[%s648_s0 + $0x92] ss:$4 sm:$0xf]  ;;  %v321_v21 = vld [vmem:[%s648_s0 + $0xa2] ss:$4 sm:$0xf]  ;;  %v130_v23 = vadd.f32 %v319_v19, %v82_v14 }
  0x1a   :  { %v322_v22 = vld [vmem:[%s648_s0 + $0xb2] ss:$4 sm:$0xf]  ;;  %v131_v24 = vadd.f32 %v320_v20, %v83_v15  ;;  %v216_v25 = vmul.f32 0.0625, %v200_v16  ;;  %v132_v26 = vadd.f32 %v321_v21, %v84_v17 }
  0x1b   :  { %v133_v27 = vadd.f32 %v322_v22, %v85_v18  ;;  %v335_v28 = vld [vmem:[%s648_s0 + $0x83] ss:$4 sm:$0xf]  ;;  %v336_v29 = vld [vmem:[%s648_s0 + $0x93] ss:$4 sm:$0xf] }
  0x1c   :  { %v337_v30 = vld [vmem:[%s648_s0 + $0xa3] ss:$4 sm:$0xf]  ;;  %v178_v31 = vadd.f32 %v335_v28, %v130_v23  ;;  %220 = vst.msk [vmem:[%s649_s1 + $0x4] sm:$0xf] %vm186_vm0, %v216_v25  ;;  %v179_v33 = vadd.f32 %v336_v29, %v131_v24 }
  0x1d   :  { %v338_v32 = vld [vmem:[%s648_s0 + $0xb3] ss:$4 sm:$0xf]  ;;  %v180_v34 = vadd.f32 %v337_v30, %v132_v26  ;;  %v291_v35 = vld [vmem:[%s648_s0 + $0xc0] ss:$4 sm:$0xf] }
  0x1e   :  { %v181_v36 = vadd.f32 %v338_v32, %v133_v27  ;;  %v201_v37 = vsel %vm186_vm0, %v178_v31, 0.0  ;;  %v292_v38 = vld [vmem:[%s648_s0 + $0xd0] ss:$4 sm:$0xf]  ;;  %v202_v39 = vsel %vm186_vm0, %v179_v33, 0.0 }
  0x1f   :  { %v204_v40 = vsel %vm186_vm0, %v180_v34, 0.0  ;;  %v293_v41 = vld [vmem:[%s648_s0 + $0xe0] ss:$4 sm:$0xf]  ;;  %v203_v42 = vadd.f32 %v202_v39, %v201_v37 }
  0x20   :  { %v206_v43 = vsel %vm186_vm0, %v181_v36, 0.0  ;;  %v294_v44 = vld [vmem:[%s648_s0 + $0xf0] ss:$4 sm:$0xf] }
  0x21   :  { %v307_v45 = vld [vmem:[%s648_s0 + $0xc1] ss:$4 sm:$0xf]  ;;  %v308_v46 = vld [vmem:[%s648_s0 + $0xd1] ss:$4 sm:$0xf]  ;;  %v205_v47 = vadd.f32 %v204_v40, %v203_v42 }
  0x22   :  { %v309_v48 = vld [vmem:[%s648_s0 + $0xe1] ss:$4 sm:$0xf]  ;;  %v310_v49 = vld [vmem:[%s648_s0 + $0xf1] ss:$4 sm:$0xf]  ;;  %v86_v50 = vadd.f32 %v307_v45, %v291_v35  ;;  %v87_v51 = vadd.f32 %v308_v46, %v292_v38 }
  0x23   :  { %v88_v52 = vadd.f32 %v309_v48, %v293_v41  ;;  %v89_v53 = vadd.f32 %v310_v49, %v294_v44  ;;  %v323_v54 = vld [vmem:[%s648_s0 + $0xc2] ss:$4 sm:$0xf]  ;;  %v324_v55 = vld [vmem:[%s648_s0 + $0xd2] ss:$4 sm:$0xf]  ;;  %v207_v56 = vadd.f32 %v206_v43, %v205_v47 }
  0x24   :  { %v325_v57 = vld [vmem:[%s648_s0 + $0xe2] ss:$4 sm:$0xf]  ;;  %v326_v58 = vld [vmem:[%s648_s0 + $0xf2] ss:$4 sm:$0xf]  ;;  %v134_v59 = vadd.f32 %v323_v54, %v86_v50  ;;  %v135_v60 = vadd.f32 %v324_v55, %v87_v51 }
  0x25   :  { %v136_v61 = vadd.f32 %v325_v57, %v88_v52  ;;  %v137_v62 = vadd.f32 %v326_v58, %v89_v53  ;;  %v339_v63 = vld [vmem:[%s648_s0 + $0xc3] ss:$4 sm:$0xf]  ;;  %v340_v0 = vld [vmem:[%s648_s0 + $0xd3] ss:$4 sm:$0xf] }
  0x26   :  { %v217_v1 = vmul.f32 0.0625, %v207_v56  ;;  %v341_v2 = vld [vmem:[%s648_s0 + $0xe3] ss:$4 sm:$0xf]  ;;  %v182_v3 = vadd.f32 %v339_v63, %v134_v59  ;;  %v183_v4 = vadd.f32 %v340_v0, %v135_v60 }
  0x27   :  { %v342_v5 = vld [vmem:[%s648_s0 + $0xf3] ss:$4 sm:$0xf]  ;;  %v184_v6 = vadd.f32 %v341_v2, %v136_v61  ;;  %v223_v7 = vld [vmem:[%s649_s1] ss:$2 sm:$0x3] }
  0x28   :  { %221 = vst.msk [vmem:[%s649_s1 + $0x8] sm:$0xf] %vm186_vm0, %v217_v1  ;;  %v185_v8 = vadd.f32 %v342_v5, %v137_v62  ;;  %v208_v9 = vsel %vm186_vm0, %v182_v3, 0.0  ;;  %v209_v10 = vsel %vm186_vm0, %v183_v4, 0.0 }
  0x29   :  { %v343_v11 = vld [vmem:[%s649_s1 + $0x4] ss:$2 sm:$0x3]  ;;  %v210_v12 = vadd.f32 %v209_v10, %v208_v9  ;;  %v211_v13 = vsel %vm186_vm0, %v184_v6, 0.0 }
  0x2a   :  { %v346_v14 = vld [vmem:[%s649_s1 + $0x1] ss:$2 sm:$0x3]  ;;  %v213_v15 = vsel %vm186_vm0, %v185_v8, 0.0 }
  0x2b   :  { %v347_v16 = vld [vmem:[%s649_s1 + $0x5] ss:$2 sm:$0x3]  ;;  %v238_v17 = vadd.f32 %v346_v14, %v223_v7  ;;  %v212_v18 = vadd.f32 %v211_v13, %v210_v12 }
  0x2c   :  { %v239_v19 = vadd.f32 %v347_v16, %v343_v11 }
  0x2d   :  { %v243_v20 = vsel %vm242_vm1, %v238_v17, 0.0  ;;  %v214_v21 = vadd.f32 %v213_v15, %v212_v18 }
  0x2e   :  { %v244_v22 = vsel %vm242_vm1, %v239_v19, 0.0 }
  0x2f   :  { %v245_v23 = vadd.f32 %v244_v22, %v243_v20  ;;  %v218_v24 = vmul.f32 0.0625, %v214_v21  ;;  %v344_v26 = vld [vmem:[%s649_s1 + $0x8] ss:$2 sm:$0x3] }
  0x30   :  { %v348_v27 = vld [vmem:[%s649_s1 + $0x9] ss:$2 sm:$0x3] }
  0x31   :  { %v249_v25 = vmul.f32 0.25, %v245_v23  ;;  %222 = vst.msk [vmem:[%s649_s1 + $0xc] sm:$0xf] %vm186_vm0, %v218_v24  ;;  %v240_v28 = vadd.f32 %v348_v27, %v344_v26 }
  0x33   :  { %251 = vst.msk [vmem:[%s650_s2] sm:$0x3] %vm242_vm1, %v249_v25  ;;  %v246_v32 = vsel %vm242_vm1, %v240_v28, 0.0 }
  0x38   :  { %v345_v29 = vld [vmem:[%s649_s1 + $0xc] ss:$2 sm:$0x3]  ;;  %v349_v30 = vld [vmem:[%s649_s1 + $0xd] ss:$2 sm:$0x3] }
  0x39   :  { %v241_v31 = vadd.f32 %v349_v30, %v345_v29 }
  0x3a   :  { %v253_v36 = vld [vmem:[%s650_s2] ss:$2 sm:$0x1]  ;;  %v351_v37 = vld [vmem:[%s650_s2 + $0x1] ss:$2 sm:$0x1] }
  0x3b   :  { %v247_v33 = vsel %vm242_vm1, %v241_v31, 0.0  ;;  %v260_v38 = vadd.f32 %v351_v37, %v253_v36 }
  0x3c   :  { %v248_v34 = vadd.f32 %v247_v33, %v246_v32 }
  0x3d   :  { %v263_v42 = vsel %vm262_vm2, %v260_v38, 0.0 }
  0x3e   :  { %v250_v35 = vmul.f32 0.25, %v248_v34 }
  0x40   :  { %252 = vst.msk [vmem:[%s650_s2 + $0x2] sm:$0x3] %vm242_vm1, %v250_v35 }
  0x47   :  { %v350_v39 = vld [vmem:[%s650_s2 + $0x2] ss:$2 sm:$0x1]  ;;  %v352_v40 = vld [vmem:[%s650_s2 + $0x3] ss:$2 sm:$0x1] }
  0x48   :  { %v261_v41 = vadd.f32 %v352_v40, %v350_v39 }
  0x4a   :  { %v264_v43 = vsel %vm262_vm2, %v261_v41, 0.0 }
  0x4b   :  { %v265_v44 = vadd.f32 %v264_v43, %v263_v42 }
  0x4d   :  { %v266_v45 = vmul.f32 0.25, %v265_v44 }
  0x4f   :  { %267 = vst.msk [vmem:[%s651_s3] sm:$0x1] %vm262_vm2, %v266_v45 }

</bundles_post_ra>
